<compile_context>
chip_gen: v6e
topology: v6e:2x2x1
jax: 0.10.0
libtpu: 0.0.40
codegen_flags: <defaults>
</compile_context>

<pallas_src>
import functools
import math

import jax
import jax.numpy as jnp
from jax.experimental import pallas as pl
from jax.experimental.pallas import tpu as pltpu


# --------------------------------------------------------------------------
# Kernel
# --------------------------------------------------------------------------
def forward_block_kernel(x_ref, w_ref, b_ref, o_ref):
    # x_ref: (TM, Cp) packed rows; w_ref: (Cp, Cp) block-diagonal kron(I, W^T);
    # b_ref: (1, Cp) tiled bias; o_ref: (TM, Cp).
    x = x_ref[...]
    y = jnp.dot(x, w_ref[...], preferred_element_type=jnp.float32) + b_ref[...]
    z = y + x.astype(jnp.float32)                                # residual
    o_ref[...] = jnp.maximum(z, 0.2 * z).astype(o_ref.dtype)     # leaky_relu(0.2)


# --------------------------------------------------------------------------
# Helpers
# --------------------------------------------------------------------------
def _round_up(a, b):
    return ((a + b - 1) // b) * b


def _choose_group(c, target_lanes):
    """Smallest g with g*c a multiple of 128, grown toward `target_lanes`."""
    g = 128 // math.gcd(c, 128)
    while g * c < target_lanes:
        g *= 2
    return g


def _default_config():
    """Pick (target_lanes, tm) per TPU generation (perf review)."""
    try:
        kind = jax.devices()[0].device_kind.lower()
    except Exception:
        kind = ""
    if "v5 lite" in kind or "v5e" in kind or "v5lite" in kind:
        # v5e: native 128-lane MXU (halves block-diag FLOP inflation) and
        # stays well under the 16 MiB default scoped VMEM.
        return 128, 2048
    if "v7" in kind:
        # v7x: 3.2 TB/s HBM -> bigger tiles amortize the ~0.35 us/step cost.
        return 256, 4096
    # v6e / default.
    return 256, 2048


def make_forward_block_params(weight, bias, group, dtype=jnp.float32):
    """Hoisted constant prep: block-diagonal weight and tiled bias (run once)."""
    c = weight.shape[0]
    w_t = weight.T.astype(dtype)                               # (C, C): x @ W^T
    w_bd = jnp.kron(jnp.eye(group, dtype=dtype), w_t)          # (Cp, Cp)
    b_p = jnp.tile(bias.astype(dtype), group).reshape(1, group * c)
    return w_bd, b_p


# --------------------------------------------------------------------------
# Wrapper
# --------------------------------------------------------------------------
@functools.partial(jax.jit, static_argnames=("group", "tm"))
def forward_block(x, w_bd, b_p, *, group, tm):
    """x: (B, S, C); w_bd: (Cp, Cp) block-diag weight; b_p: (1, Cp); Cp = group*C."""
    B, S, C = x.shape
    M = B * S
    Cp = group * C
    dtype = x.dtype

    # ---- lane-dense repack: (M, C) -> (Mp_pad, Cp) -------------------------
    # Pad only to a multiple of (8 * group) original rows (never to a tile
    # multiple); the grid handles the ragged remainder via pl.cdiv + masking.
    Mp = pl.cdiv(M, group)
    Mp_pad = _round_up(Mp, 8)
    M_pad = Mp_pad * group

    x2 = x.reshape(M, C)
    if M_pad != M:
        x2 = jnp.pad(x2, ((0, M_pad - M), (0, 0)))
    xp = x2.reshape(Mp_pad, Cp)

    # ---- tile size: big, but always >= 2 grid steps when possible ----------
    if Mp_pad > 8:
        tm_eff = min(tm, _round_up(pl.cdiv(Mp_pad, 2), 8))
    else:
        tm_eff = 8
    grid = (pl.cdiv(Mp_pad, tm_eff),)

    cost = pl.CostEstimate(
        flops=2 * grid[0] * tm_eff * Cp * Cp,            # actual MXU work
        transcendentals=0,
        bytes_accessed=(2 * Mp_pad * Cp + Cp * Cp + Cp) * x.dtype.itemsize,
    )

    out = pl.pallas_call(
        forward_block_kernel,
        out_shape=jax.ShapeDtypeStruct((Mp_pad, Cp), dtype),
        grid_spec=pltpu.PrefetchScalarGridSpec(
            num_scalar_prefetch=0,
            grid=grid,
            in_specs=[
                pl.BlockSpec((tm_eff, Cp), lambda i: (i, 0)),   # packed x rows
                pl.BlockSpec((Cp, Cp), lambda i: (0, 0)),       # resident weight
                pl.BlockSpec((1, Cp), lambda i: (0, 0)),        # bias row
            ],
            out_specs=pl.BlockSpec((tm_eff, Cp), lambda i: (i, 0)),
        ),
        compiler_params=pltpu.CompilerParams(
            dimension_semantics=("parallel",),   # lets v7x shard rows across 2 TCs
        ),
        cost_estimate=cost,
    )(xp, w_bd, b_p)

    out = out.reshape(M_pad, C)
    if M_pad != M:
        out = out[:M]
    return out.reshape(B, S, C)


# --------------------------------------------------------------------------
# Reference + test
# --------------------------------------------------------------------------
def reference(x, weight, bias):
    y = jnp.einsum("bsc,oc->bso", x, weight) + bias
    z = y + x
    return jnp.where(z >= 0, z, 0.2 * z)


if __name__ == "__main__":
    # Small shapes consistent with the module: last dim = n_channels.
    B, S, C = 2, 8, 32
    key = jax.random.PRNGKey(0)
    kx, kw, kb = jax.random.split(key, 3)

    x = jax.random.normal(kx, (B, S, C), dtype=jnp.float32)
    # TODO(synk): make_initializer(0.1) is not defined in the spec; parameters
    # are mimicked with deterministic 0.1-scale normal init.
    weight = 0.1 * jax.random.normal(kw, (C, C), dtype=jnp.float32)  # (out, in)
    bias = 0.1 * jax.random.normal(kb, (C,), dtype=jnp.float32)

    target_lanes, tm = _default_config()
    group = _choose_group(C, target_lanes)

    # Constant prep hoisted out of the per-call path (weights are static).
    w_bd, b_p = make_forward_block_params(weight, bias, group, dtype=x.dtype)

    out = forward_block(x, w_bd, b_p, group=group, tm=tm)
    out = jax.block_until_ready(out)

    ref = reference(x, weight, bias)
    assert out.shape == (B, S, C)
    assert jnp.allclose(out, ref, atol=1e-5, rtol=1e-5), "mismatch vs reference"
    print("KERNEL_OK")
</pallas_src>

<mosaic_0001>
module attributes {stable_mosaic.version = 11 : i64} {
  func.func @forward_block_kernel(%arg0: i32, %arg1: memref<8x256xf32, #tpu.memory_space<vmem>>, %arg2: memref<256x256xf32, #tpu.memory_space<vmem>>, %arg3: memref<1x256xf32, #tpu.memory_space<vmem>>, %arg4: memref<8x256xf32, #tpu.memory_space<vmem>>) attributes {dimension_semantics = [#tpu.dimension_semantics<parallel>], iteration_bounds = array<i64: 1>, scalar_prefetch = 0 : i64, scratch_operands = 0 : i64, tpu.core_type = #tpu.core_type<tc>, window_params = [{transform_indices = @transform_0, window_bounds = array<i64: 8, 256>}, {pipeline_mode = #tpu.pipeline_mode<synchronous>, transform_indices = @transform_1, window_bounds = array<i64: 256, 256>}, {pipeline_mode = #tpu.pipeline_mode<synchronous>, transform_indices = @transform_2, window_bounds = array<i64: 1, 256>}, {transform_indices = @transform_3, window_bounds = array<i64: 8, 256>}]} {
    %c0 = arith.constant 0 : index
    %c0_0 = arith.constant 0 : index
    %0 = vector.load %arg1[%c0, %c0_0] : memref<8x256xf32, #tpu.memory_space<vmem>>, vector<8x256xf32>
    %c0_1 = arith.constant 0 : index
    %c0_2 = arith.constant 0 : index
    %1 = vector.load %arg2[%c0_1, %c0_2] : memref<256x256xf32, #tpu.memory_space<vmem>>, vector<256x256xf32>
    %cst = arith.constant dense<0.000000e+00> : vector<8x256xf32>
    %2 = tpu.matmul %0, %1, %cst {dimension_numbers = #tpu.dot_dimension_numbers<[1], [0], [0], [1], [0, 0, 1, 1], [], []>} : vector<8x256xf32>, vector<256x256xf32>, vector<8x256xf32> -> vector<8x256xf32>
    %c0_3 = arith.constant 0 : index
    %c0_4 = arith.constant 0 : index
    %3 = vector.load %arg3[%c0_3, %c0_4] : memref<1x256xf32, #tpu.memory_space<vmem>>, vector<1x256xf32>
    %4 = vector.broadcast %3 : vector<1x256xf32> to vector<8x256xf32>
    %5 = arith.addf %2, %4 : vector<8x256xf32>
    %6 = arith.addf %5, %0 : vector<8x256xf32>
    %cst_5 = arith.constant 2.000000e-01 : f32
    %7 = vector.broadcast %cst_5 : f32 to vector<8x256xf32>
    %8 = arith.mulf %7, %6 : vector<8x256xf32>
    %9 = arith.maximumf %6, %8 : vector<8x256xf32>
    %c0_6 = arith.constant 0 : index
    %c0_7 = arith.constant 0 : index
    %10 = vector.load %arg4[%c0_6, %c0_7] : memref<8x256xf32, #tpu.memory_space<vmem>>, vector<8x256xf32>
    tpu.vector_store %arg4[%c0_6, %c0_7], %9 {strides = array<i32>} : memref<8x256xf32, #tpu.memory_space<vmem>>, vector<8x256xf32>,
    return
  }
  func.func @transform_0(%arg0: i32) -> (i32, i32) {
    %c0_i32 = arith.constant 0 : i32
    %c0_i32_0 = arith.constant 0 : i32
    return %arg0, %c0_i32 : i32, i32
  }
  func.func @transform_1(%arg0: i32) -> (i32, i32) {
    %c0_i32 = arith.constant 0 : i32
    %c0_i32_0 = arith.constant 0 : i32
    %c0_i32_1 = arith.constant 0 : i32
    return %c0_i32, %c0_i32_0 : i32, i32
  }
  func.func @transform_2(%arg0: i32) -> (i32, i32) {
    %c0_i32 = arith.constant 0 : i32
    %c0_i32_0 = arith.constant 0 : i32
    %c0_i32_1 = arith.constant 0 : i32
    return %c0_i32, %c0_i32_0 : i32, i32
  }
  func.func @transform_3(%arg0: i32) -> (i32, i32) {
    %c0_i32 = arith.constant 0 : i32
    %c0_i32_0 = arith.constant 0 : i32
    return %arg0, %c0_i32 : i32, i32
  }
}

</mosaic_0001>

<bundles_post_ra>
// kernel: forward_block.1
= control target key start
LH: loop header
LB: loop body
LE: loop exit
PB: predicated region body
PF: predicated region fallthrough
CT: control target
= control target key end

     0   :  { %8 = vsyncpa [#allocation3], 0  ;;  %s215_s12 = smov [#allocation2]   ;;  %s260_s0 = inlined_call_operand.vmem [shape: f32[8,256], index: 0, kind: input, shape index: {}]   ;;  %s261_s1 = inlined_call_operand.hbm [shape: f32[256,256], index: 1, kind: input, shape index: {}]   ;;  %s262_s2 = inlined_call_operand.vmem [shape: f32[1,256], index: 2, kind: input, shape index: {}]   ;;  %s263_s3 = inlined_call_operand.vmem [shape: f32[8,256], index: 3, kind: output, shape index: {}]  }
   0x1   :  { %s16_s13 = sshll.u32 %s215_s12, 4  ;;  %s17_s13 = int_to_ptr.vmem [resolvable:$true] %s16_s13 }
   0x2   :  { %s201_s14 = scalar_lea.vmem %s17_s13, 8192  ;;  %p206_p1 = scmp.lt.s32.totalorder %s17_s13, %s17_s13 }
   0x3   :  { %p202_p0 = scmp.ne.s32.totalorder %s17_s13, %s201_s14  ;;  %p207_p2 = scmp.lt.s32.totalorder %s201_s14, %s201_s14 }
   0x5   :  { %p208_p3 = por %p207_p2, %p206_p1 }
   0x7   :  { %p209_p4 = pnand %p208_p3, %p202_p0 }
   0x9   :  { %212 = shalt.err (!%p209_p4)
}
   0xa   :  { %s216_s15 = smov 256   ;;  %s217_s16 = smov 16  }
   0xb   :  { %22 = dma.hbm_to_vmem [thread:$0]  %s261_s1, 8192, %s17_s13, [#allocation3], %s216_s15, %s216_s15, %s217_s16  }
   0xc   :  { %213 = dma.done.wait [#allocation3], 8192  }
   0xd   :  { %214 = vsyncadd [#allocation3], 4294959104  ;;  %v61_v0 = vld [vmem:[#allocation2 + $0xf8] sm:$0xff]  ;;  %v60_v1 = vld [vmem:[#allocation2 + $0xf0] sm:$0xff] }
   0xe   :  { %v59_v2 = vld [vmem:[#allocation2 + $0xe8] sm:$0xff]  ;;  %106 = vmatprep.subr.mxu0 %v61_v0  ;;  %v58_v3 = vld [vmem:[#allocation2 + $0xe0] sm:$0xff]  ;;  %v57_v4 = vld [vmem:[#allocation2 + $0xd8] sm:$0xff] }
   0xf   :  { %107 = vmatpush1.msra.mxu0 %v60_v1  ;;  %v56_v5 = vld [vmem:[#allocation2 + $0xd0] sm:$0xff]  ;;  %v55_v6 = vld [vmem:[#allocation2 + $0xc8] sm:$0xff]  ;;  %v54_v7 = vld [vmem:[#allocation2 + $0xc0] sm:$0xff] }
  0x10   :  { %108 = vmatprep.subr.mxu0 %v59_v2  ;;  %v53_v8 = vld [vmem:[#allocation2 + $0xb8] sm:$0xff]  ;;  %v52_v9 = vld [vmem:[#allocation2 + $0xb0] sm:$0xff]  ;;  %v51_v10 = vld [vmem:[#allocation2 + $0xa8] sm:$0xff]  ;;  %v96_v2 = vlaneseq }
  0x11   :  { %109 = vmatpush1.msra.mxu0 %v58_v3  ;;  %v50_v11 = vld [vmem:[#allocation2 + $0xa0] sm:$0xff]  ;;  %v49_v12 = vld [vmem:[#allocation2 + $0x98] sm:$0xff]  ;;  %v48_v13 = vld [vmem:[#allocation2 + $0x90] sm:$0xff] }
  0x12   :  { %110 = vmatprep.subr.mxu0 %v57_v4  ;;  %v47_v14 = vld [vmem:[#allocation2 + $0x88] sm:$0xff]  ;;  %v46_v15 = vld [vmem:[#allocation2 + $0x80] sm:$0xff]  ;;  %v45_v16 = vld [vmem:[#allocation2 + $0x78] sm:$0xff]  ;;  %v97_v3 = vshrl.u32 %v96_v2, 7 }
  0x13   :  { %111 = vmatpush1.msra.mxu0 %v56_v5  ;;  %v44_v17 = vld [vmem:[#allocation2 + $0x70] sm:$0xff]  ;;  %v43_v18 = vld [vmem:[#allocation2 + $0x68] sm:$0xff]  ;;  %v42_v19 = vld [vmem:[#allocation2 + $0x60] sm:$0xff] }
  0x14   :  { %112 = vmatprep.subr.mxu0 %v55_v6  ;;  %v41_v20 = vld [vmem:[#allocation2 + $0x58] sm:$0xff]  ;;  %v40_v21 = vld [vmem:[#allocation2 + $0x50] sm:$0xff]  ;;  %v39_v22 = vld [vmem:[#allocation2 + $0x48] sm:$0xff]  ;;  %v98_v4 = vsub.s32 0, %v97_v3  ;;  %v102_v6 = vsub.s32 1, %v97_v3 }
  0x15   :  { %113 = vmatpush1.msra.mxu0 %v54_v7  ;;  %v38_v23 = vld [vmem:[#allocation2 + $0x40] sm:$0xff]  ;;  %v244_v24 = vld [vmem:[%s260_s0 + $0x8] sm:$0xff]  ;;  %v37_v25 = vld [vmem:[#allocation2 + $0x38] sm:$0xff] }
  0x16   :  { %114 = vmatprep.subr.mxu0 %v53_v8  ;;  %170 = vmatprep.mubr.f32.mxu0 %v244_v24  ;;  %v36_v26 = vld [vmem:[#allocation2 + $0x30] sm:$0xff]  ;;  %v35_v27 = vld [vmem:[#allocation2 + $0x28] sm:$0xff]  ;;  %v34_v28 = vld [vmem:[#allocation2 + $0x20] sm:$0xff] }
  0x17   :  { %115 = vmatpush1.msra.mxu0 %v52_v9  ;;  %v33_v29 = vld [vmem:[#allocation2 + $0x18] sm:$0xff]  ;;  %v32_v30 = vld [vmem:[#allocation2 + $0x10] sm:$0xff]  ;;  %v31_v31 = vld [vmem:[#allocation2 + $0x8] sm:$0xff] }
  0x18   :  { %116 = vmatprep.subr.mxu0 %v51_v10  ;;  %v30_v32 = vld [vmem:[#allocation2] sm:$0xff]  ;;  %v93_v33 = vld [vmem:[#allocation2 + $0x1f8] sm:$0xff]  ;;  %v92_v34 = vld [vmem:[#allocation2 + $0x1f0] sm:$0xff] }
  0x19   :  { %117 = vmatpush1.msra.mxu0 %v50_v11  ;;  %v91_v35 = vld [vmem:[#allocation2 + $0x1e8] sm:$0xff]  ;;  %v90_v36 = vld [vmem:[#allocation2 + $0x1e0] sm:$0xff]  ;;  %v89_v37 = vld [vmem:[#allocation2 + $0x1d8] sm:$0xff] }
  0x1a   :  { %118 = vmatprep.subr.mxu0 %v49_v12  ;;  %v88_v38 = vld [vmem:[#allocation2 + $0x1d0] sm:$0xff]  ;;  %v87_v39 = vld [vmem:[#allocation2 + $0x1c8] sm:$0xff]  ;;  %v86_v40 = vld [vmem:[#allocation2 + $0x1c0] sm:$0xff] }
  0x1b   :  { %119 = vmatpush1.msra.mxu0 %v48_v13  ;;  %v85_v41 = vld [vmem:[#allocation2 + $0x1b8] sm:$0xff]  ;;  %v84_v42 = vld [vmem:[#allocation2 + $0x1b0] sm:$0xff]  ;;  %v83_v43 = vld [vmem:[#allocation2 + $0x1a8] sm:$0xff] }
  0x1c   :  { %120 = vmatprep.subr.mxu0 %v47_v14  ;;  %v82_v44 = vld [vmem:[#allocation2 + $0x1a0] sm:$0xff]  ;;  %v81_v45 = vld [vmem:[#allocation2 + $0x198] sm:$0xff]  ;;  %v80_v46 = vld [vmem:[#allocation2 + $0x190] sm:$0xff] }
  0x1d   :  { %121 = vmatpush1.msra.mxu0 %v46_v15  ;;  %v79_v47 = vld [vmem:[#allocation2 + $0x188] sm:$0xff]  ;;  %v78_v48 = vld [vmem:[#allocation2 + $0x180] sm:$0xff]  ;;  %v77_v49 = vld [vmem:[#allocation2 + $0x178] sm:$0xff] }
  0x1e   :  { %122 = vmatprep.subr.mxu0 %v45_v16  ;;  %v76_v50 = vld [vmem:[#allocation2 + $0x170] sm:$0xff]  ;;  %v75_v51 = vld [vmem:[#allocation2 + $0x168] sm:$0xff]  ;;  %v74_v52 = vld [vmem:[#allocation2 + $0x160] sm:$0xff] }
  0x1f   :  { %123 = vmatpush1.msra.mxu0 %v44_v17  ;;  %v73_v53 = vld [vmem:[#allocation2 + $0x158] sm:$0xff]  ;;  %v72_v54 = vld [vmem:[#allocation2 + $0x150] sm:$0xff]  ;;  %v71_v55 = vld [vmem:[#allocation2 + $0x148] sm:$0xff] }
  0x20   :  { %124 = vmatprep.subr.mxu0 %v43_v18  ;;  %v70_v56 = vld [vmem:[#allocation2 + $0x140] sm:$0xff]  ;;  %v69_v57 = vld [vmem:[#allocation2 + $0x138] sm:$0xff]  ;;  %v68_v58 = vld [vmem:[#allocation2 + $0x130] sm:$0xff] }
  0x21   :  { %125 = vmatpush1.msra.mxu0 %v42_v19  ;;  %v67_v59 = vld [vmem:[#allocation2 + $0x128] sm:$0xff]  ;;  %v66_v60 = vld [vmem:[#allocation2 + $0x120] sm:$0xff]  ;;  %v65_v61 = vld [vmem:[#allocation2 + $0x118] sm:$0xff] }
  0x22   :  { %126 = vmatprep.subr.mxu0 %v41_v20  ;;  %v64_v62 = vld [vmem:[#allocation2 + $0x110] sm:$0xff]  ;;  %v63_v63 = vld [vmem:[#allocation2 + $0x108] sm:$0xff]  ;;  %v62_v0 = vld [vmem:[#allocation2 + $0x100] sm:$0xff] }
  0x23   :  { %127 = vmatpush1.msra.mxu0 %v40_v21  ;;  %v28_v1 = vld [vmem:[%s260_s0] sm:$0xff] }
  0x24   :  { %128 = vmatprep.subr.mxu0 %v39_v22  ;;  %v94_v5 = vld [vmem:[%s262_s2] sm:$0x3] }
  0x25   :  { %129 = vmatpush1.msra.mxu0 %v38_v23  ;;  %v99_v7 = vrot.slane %v94_v5, %v98_v4  ;;  %v103_v8 = vrot.slane %v94_v5, %v102_v6 }
  0x26   :  { %130 = vmatprep.subr.mxu0 %v37_v25 }
  0x27   :  { %131 = vmatpush1.msra.mxu0 %v36_v26 }
  0x28   :  { %132 = vmatprep.subr.mxu0 %v35_v27 }
  0x29   :  { %133 = vmatpush1.msra.mxu0 %v34_v28 }
  0x2a   :  { %134 = vmatprep.subr.mxu0 %v33_v29 }
  0x2b   :  { %135 = vmatpush1.msra.mxu0 %v32_v30 }
  0x2c   :  { %136 = vmatprep.subr.mxu0 %v31_v31 }
  0x2d   :  { %137 = vmatpush1.msra.mxu0 %v30_v32 }
  0x2e   :  { %138 = vmatprep.subr.mxu0 %v93_v33 }
  0x2f   :  { %139 = vmatpush2.msra.mxu0 %v92_v34 }
  0x30   :  { %140 = vmatprep.subr.mxu0 %v91_v35 }
  0x31   :  { %141 = vmatpush2.msra.mxu0 %v90_v36 }
  0x32   :  { %142 = vmatprep.subr.mxu0 %v89_v37 }
  0x33   :  { %143 = vmatpush2.msra.mxu0 %v88_v38 }
  0x34   :  { %144 = vmatprep.subr.mxu0 %v87_v39 }
  0x35   :  { %145 = vmatpush2.msra.mxu0 %v86_v40 }
  0x36   :  { %146 = vmatprep.subr.mxu0 %v85_v41 }
  0x37   :  { %147 = vmatpush2.msra.mxu0 %v84_v42 }
  0x38   :  { %148 = vmatprep.subr.mxu0 %v83_v43 }
  0x39   :  { %149 = vmatpush2.msra.mxu0 %v82_v44 }
  0x3a   :  { %150 = vmatprep.subr.mxu0 %v81_v45 }
  0x3b   :  { %151 = vmatpush2.msra.mxu0 %v80_v46 }
  0x3c   :  { %152 = vmatprep.subr.mxu0 %v79_v47 }
  0x3d   :  { %153 = vmatpush2.msra.mxu0 %v78_v48 }
  0x3e   :  { %154 = vmatprep.subr.mxu0 %v77_v49 }
  0x3f   :  { %155 = vmatpush2.msra.mxu0 %v76_v50 }
  0x40   :  { %156 = vmatprep.subr.mxu0 %v75_v51 }
  0x41   :  { %157 = vmatpush2.msra.mxu0 %v74_v52 }
  0x42   :  { %158 = vmatprep.subr.mxu0 %v73_v53 }
  0x43   :  { %159 = vmatpush2.msra.mxu0 %v72_v54 }
  0x44   :  { %160 = vmatprep.subr.mxu0 %v71_v55 }
  0x45   :  { %161 = vmatpush2.msra.mxu0 %v70_v56 }
  0x46   :  { %162 = vmatprep.subr.mxu0 %v69_v57 }
  0x47   :  { %163 = vmatpush2.msra.mxu0 %v68_v58 }
  0x48   :  { %164 = vmatprep.subr.mxu0 %v67_v59 }
  0x49   :  { %165 = vmatpush2.msra.mxu0 %v66_v60 }
  0x4a   :  { %166 = vmatprep.subr.mxu0 %v65_v61 }
  0x4b   :  { %167 = vmatpush2.msra.mxu0 %v64_v62 }
  0x4c   :  { %168 = vmatprep.subr.mxu0 %v63_v63 }
  0x4d   :  { %169 = vmatpush2.msra.mxu0 %v62_v0 }
  0x4e   :  { %171 = vmatmul.mubr.f32.vlgmr.msra.gmra.mxu0 %v28_v1 }
 0x10e   :  { %v172_v9 = vpop.f32.mrf.mxu0 }
 0x10f   :  { %v173_v10 = vadd.f32 %v172_v9, %v99_v7 }
 0x110   :  { %v174_v11 = vpop.f32.mrf.mxu0 }
 0x111   :  { %v177_v12 = vadd.f32 %v173_v10, %v28_v1  ;;  %v175_v13 = vadd.f32 %v174_v11, %v103_v8 }
 0x113   :  { %v179_v14 = vmul.f32 0.2, %v177_v12  ;;  %v178_v15 = vadd.f32 %v175_v13, %v244_v24 }
 0x115   :  { %v181_v16 = vmax.f32 %v177_v12, %v179_v14  ;;  %v180_v17 = vmul.f32 0.2, %v178_v15 }
 0x117   :  { %183 = vst [vmem:[%s263_s3] sm:$0xff] %v181_v16  ;;  %v182_v18 = vmax.f32 %v178_v15, %v180_v17 }
 0x119   :  { %184 = vst [vmem:[%s263_s3 + $0x8] sm:$0xff] %v182_v18 }
 0x11a   :  { %189 = vsyncpa [#allocation3], 1 }

</bundles_post_ra>
